<compile_context>
chip_gen: v7x
topology: tpu7x:2x2x1
jax: 0.10.0
libtpu: 0.0.40
codegen_flags: <defaults>
</compile_context>

<pallas_src>
import functools
import math

import jax
import jax.numpy as jnp
from jax.experimental import pallas as pl
from jax.experimental.pallas import tpu as pltpu  # noqa: F401  (CompilerParams when N scales)


# --------------------------------------------------------------------------
# In-kernel helpers
# --------------------------------------------------------------------------
def _leaky_relu(x, neg_slope):
    return jnp.where(x > 0, x, neg_slope * x)


def _elu(x):
    return jnp.where(x > 0, x, jnp.exp(jnp.minimum(x, 0.0)) - 1.0)


def _gat_conv(h_in, mask, fc_w, al, ar, bias, H, D, neg_slope, residual, act):
    """One dense-graph GATConv with all heads batched. Returns (N, H, D)."""
    N = h_in.shape[0]
    z = jnp.dot(h_in, fc_w, preferred_element_type=jnp.float32)       # (N, H*D)
    z3 = z.reshape(N, H, D)

    # Per-head attention logits on the VPU (no selection-matrix matmul).
    el = jnp.sum(z3 * al[None, :, :], axis=-1)                        # (N, H) sender score
    er = jnp.sum(z3 * ar[None, :, :], axis=-1)                        # (N, H) receiver score

    # e[h, v, u] = leaky_relu(er[v, h] + el[u, h]); softmax over senders u (last axis).
    e = er.T[:, :, None] + el.T[:, None, :]                           # (H, Nr, Ns)
    e = _leaky_relu(e, neg_slope)
    e = jnp.where(mask[None, :, :], e, -1e30)
    m = jnp.max(e, axis=-1, keepdims=True)
    p = jnp.where(mask[None, :, :], jnp.exp(e - m), 0.0)
    # TODO(synk): zero-in-degree guard (nodes with no in-edges get all-zero alpha);
    # DGL GATConv would raise unless allow_zero_in_degree=True.
    denom = jnp.maximum(jnp.sum(p, axis=-1, keepdims=True), 1e-9)
    alpha = p / denom                                                 # (H, Nr, Ns), exact f32

    # Batched-head aggregation on the MXU: (H, Nr, Ns) @ (H, Ns, D) -> (H, Nr, D).
    z_h = jnp.transpose(z3, (1, 0, 2))                                # (H, Ns, D)
    rst = jnp.einsum('hvu,hud->hvd', alpha, z_h,
                     preferred_element_type=jnp.float32)
    rst = jnp.transpose(rst, (1, 0, 2))                               # (N, H, D)

    if residual:
        # TODO(synk): identity residual only (in_feats == H*D in this config);
        # DGL GATConv uses a learned res_fc projection when dims differ.
        rst = rst + h_in.reshape(N, H, D)
    rst = rst + bias.reshape(1, H, D)
    if act == 'elu':
        rst = _elu(rst)
    return rst


# --------------------------------------------------------------------------
# Fused whole-GAT kernel: all layers in one pallas_call
# --------------------------------------------------------------------------
def _gat_fused_kernel(layer_meta, neg_slope, h_ref, adjT_ref, *rest):
    *w_refs, o_ref = rest
    mask = adjT_ref[...] > 0.0                     # mask[v, u] = edge u -> v
    h = h_ref[...]
    N = h.shape[0]
    for li, (H, D, residual, act, combine) in enumerate(layer_meta):
        fc_w = w_refs[4 * li][...]
        al = w_refs[4 * li + 1][...]
        ar = w_refs[4 * li + 2][...]
        bias = w_refs[4 * li + 3][...]
        rst = _gat_conv(h, mask, fc_w, al, ar, bias, H, D,
                        neg_slope, residual, act)
        if combine == 'flatten':
            h = rst.reshape(N, H * D)              # .flatten(1)
        else:
            h = jnp.mean(rst, axis=1)              # .mean(1)
    o_ref[...] = h                                 # single dense store


def gat_forward(attr, adjT, params, cfg):
    """Full GAT forward in one fused kernel (single whole-graph block).

    TODO(synk): for large N, add a grid over receiver rows with
    dimension_semantics=("parallel",) and row-tile the (H, N, N) score tensor
    (softmax is over senders, so it stays inside a row tile); needed for v7x's
    64 MiB VMEM and to use its second TensorCore.
    """
    N = attr.shape[0]
    layer_meta = tuple(l['meta'] for l in params['layers'])
    H_last, D_last, _, _, combine_last = layer_meta[-1]
    out_dim = D_last if combine_last == 'mean' else H_last * D_last
    args = [attr, adjT]
    for l in params['layers']:
        args += [l['fc_w'], l['attn_l'], l['attn_r'], l['bias']]
    return pl.pallas_call(
        functools.partial(_gat_fused_kernel, layer_meta,
                          cfg['GAT_negative_slope']),
        out_shape=jax.ShapeDtypeStruct((N, out_dim), jnp.float32),
    )(*args)


# --------------------------------------------------------------------------
# Parameter init (weight packing hoisted here, nothing packed per-forward)
# --------------------------------------------------------------------------
def init_gat_params(key, cfg):
    H = cfg['GAT_heads']
    num_layers = cfg['GAT_layers'] - 1
    assert num_layers >= 1
    dims = [(cfg['GAT_indim'], cfg['GAT_hiddim'], False, 'elu', 'flatten')]
    for _ in range(num_layers - 1):
        dims.append((cfg['GAT_hiddim'] * H, cfg['GAT_hiddim'],
                     cfg['GAT_residual'], 'elu', 'flatten'))
    dims.append((cfg['GAT_hiddim'] * H, cfg['GAT_outdim'],
                 cfg['GAT_residual'], None, 'mean'))
    layers = []
    for din, dout, residual, act, combine in dims:
        key, k1, k2, k3 = jax.random.split(key, 4)
        gain = math.sqrt(2.0)
        s_fc = gain * math.sqrt(2.0 / (din + H * dout))     # xavier-normal-ish (DGL)
        s_a = gain * math.sqrt(2.0 / (1 + dout))
        layers.append({
            'fc_w': s_fc * jax.random.normal(k1, (din, H * dout), jnp.float32),
            'attn_l': s_a * jax.random.normal(k2, (H, dout), jnp.float32),
            'attn_r': s_a * jax.random.normal(k3, (H, dout), jnp.float32),
            'bias': jnp.zeros((1, H * dout), jnp.float32),
            'meta': (H, dout, residual, act, combine),
        })
    return {'layers': layers}


# --------------------------------------------------------------------------
# Pure-JAX reference (same math, no Pallas) for a correctness check
# --------------------------------------------------------------------------
def gat_reference(attr, adjT, params, cfg):
    mask = adjT > 0.0
    neg_slope = cfg['GAT_negative_slope']
    h = attr
    N = attr.shape[0]
    for l in params['layers']:
        H, D, residual, act, combine = l['meta']
        z = jnp.dot(h, l['fc_w'], precision=jax.lax.Precision.HIGHEST)
        z3 = z.reshape(N, H, D)
        el = jnp.sum(z3 * l['attn_l'][None], axis=-1)
        er = jnp.sum(z3 * l['attn_r'][None], axis=-1)
        e = er.T[:, :, None] + el.T[:, None, :]
        e = jnp.where(e > 0, e, neg_slope * e)
        e = jnp.where(mask[None], e, -1e30)
        m = jnp.max(e, axis=-1, keepdims=True)
        p = jnp.where(mask[None], jnp.exp(e - m), 0.0)
        denom = jnp.maximum(jnp.sum(p, axis=-1, keepdims=True), 1e-9)
        alpha = p / denom
        rst = jnp.einsum('hvu,hud->hvd', alpha, jnp.transpose(z3, (1, 0, 2)),
                         precision=jax.lax.Precision.HIGHEST)
        rst = jnp.transpose(rst, (1, 0, 2))
        if residual:
            rst = rst + h.reshape(N, H, D)
        rst = rst + l['bias'].reshape(1, H, D)
        if act == 'elu':
            rst = jnp.where(rst > 0, rst, jnp.exp(jnp.minimum(rst, 0.0)) - 1.0)
        h = rst.reshape(N, H * D) if combine == 'flatten' else jnp.mean(rst, axis=1)
    return h


# --------------------------------------------------------------------------
# Main
# --------------------------------------------------------------------------
if __name__ == "__main__":
    cfg = dict(
        GAT_layers=2, GAT_indim=8, GAT_hiddim=8, GAT_outdim=8, GAT_heads=2,
        GAT_feat_drop=0.0, GAT_attn_drop=0.0, GAT_negative_slope=0.2,
        GAT_residual=True,
    )
    N = 8  # number of regions / graph nodes

    key = jax.random.PRNGKey(0)
    k_attr, k_param = jax.random.split(key)
    attr = jax.random.normal(k_attr, (N, cfg['GAT_indim']), jnp.float32)

    # deterministic graph: self-loops + ring + 2nd-neighbor edges (dense mask)
    src, dst = [], []
    for i in range(N):
        src += [i, i, i]
        dst += [i, (i + 1) % N, (i + 2) % N]
    src = jnp.array(src, jnp.int32)
    dst = jnp.array(dst, jnp.int32)
    adj = jnp.zeros((N, N), jnp.float32).at[src, dst].set(1.0)
    adjT = adj.T   # adjT[v, u] = 1 iff edge u -> v (softmax is over senders u)

    params = init_gat_params(k_param, cfg)

    fwd = jax.jit(lambda a, m: gat_forward(a, m, params, cfg))
    out = jax.block_until_ready(fwd(attr, adjT))
    assert out.shape == (N, cfg['GAT_outdim']), out.shape
    assert bool(jnp.all(jnp.isfinite(out)))

    ref = gat_reference(attr, adjT, params, cfg)
    assert bool(jnp.allclose(out, ref, rtol=1e-2, atol=1e-2)), \
        float(jnp.max(jnp.abs(out - ref)))
    print("KERNEL_OK")
</pallas_src>

<mosaic_0001>
module attributes {stable_mosaic.version = 11 : i64} {
  func.func @_gat_fused_kernel(%arg0: memref<8x8xf32, #tpu.memory_space<vmem>>, %arg1: memref<8x8xf32, #tpu.memory_space<vmem>>, %arg2: memref<8x16xf32, #tpu.memory_space<vmem>>, %arg3: memref<2x8xf32, #tpu.memory_space<vmem>>, %arg4: memref<2x8xf32, #tpu.memory_space<vmem>>, %arg5: memref<1x16xf32, #tpu.memory_space<vmem>>, %arg6: memref<16x16xf32, #tpu.memory_space<vmem>>, %arg7: memref<2x8xf32, #tpu.memory_space<vmem>>, %arg8: memref<2x8xf32, #tpu.memory_space<vmem>>, %arg9: memref<1x16xf32, #tpu.memory_space<vmem>>, %arg10: memref<8x8xf32, #tpu.memory_space<vmem>>) attributes {dimension_semantics = [], scalar_prefetch = 0 : i64, scratch_operands = 0 : i64, tpu.core_type = #tpu.core_type<tc>} {
    %c0 = arith.constant 0 : index
    %c0_0 = arith.constant 0 : index
    %0 = vector.load %arg1[%c0, %c0_0] : memref<8x8xf32, #tpu.memory_space<vmem>>, vector<8x8xf32>
    %cst = arith.constant 0.000000e+00 : f32
    %1 = vector.broadcast %cst : f32 to vector<8x8xf32>
    %2 = arith.cmpf ogt, %0, %1 : vector<8x8xf32>
    %c0_1 = arith.constant 0 : index
    %c0_2 = arith.constant 0 : index
    %3 = vector.load %arg0[%c0_1, %c0_2] : memref<8x8xf32, #tpu.memory_space<vmem>>, vector<8x8xf32>
    %c0_3 = arith.constant 0 : index
    %c0_4 = arith.constant 0 : index
    %4 = vector.load %arg2[%c0_3, %c0_4] : memref<8x16xf32, #tpu.memory_space<vmem>>, vector<8x16xf32>
    %c0_5 = arith.constant 0 : index
    %c0_6 = arith.constant 0 : index
    %5 = vector.load %arg3[%c0_5, %c0_6] : memref<2x8xf32, #tpu.memory_space<vmem>>, vector<2x8xf32>
    %c0_7 = arith.constant 0 : index
    %c0_8 = arith.constant 0 : index
    %6 = vector.load %arg4[%c0_7, %c0_8] : memref<2x8xf32, #tpu.memory_space<vmem>>, vector<2x8xf32>
    %c0_9 = arith.constant 0 : index
    %c0_10 = arith.constant 0 : index
    %7 = vector.load %arg5[%c0_9, %c0_10] : memref<1x16xf32, #tpu.memory_space<vmem>>, vector<1x16xf32>
    %cst_11 = arith.constant dense<0.000000e+00> : vector<8x16xf32>
    %8 = tpu.matmul %3, %4, %cst_11 {dimension_numbers = #tpu.dot_dimension_numbers<[1], [0], [0], [1], [0, 0, 1, 1], [], []>} : vector<8x8xf32>, vector<8x16xf32>, vector<8x16xf32> -> vector<8x16xf32>
    %9 = vector.shape_cast %8 : vector<8x16xf32> to vector<8x2x8xf32>
    %10 = vector.shape_cast %5 : vector<2x8xf32> to vector<1x2x8xf32>
    %11 = vector.broadcast %10 : vector<1x2x8xf32> to vector<8x2x8xf32>
    %12 = arith.mulf %9, %11 : vector<8x2x8xf32>
    %cst_12 = arith.constant dense<0.000000e+00> : vector<8x2xf32>
    %13 = vector.multi_reduction <add>, %12, %cst_12 [2] : vector<8x2x8xf32> to vector<8x2xf32>
    %14 = vector.shape_cast %6 : vector<2x8xf32> to vector<1x2x8xf32>
    %15 = vector.broadcast %14 : vector<1x2x8xf32> to vector<8x2x8xf32>
    %16 = arith.mulf %9, %15 : vector<8x2x8xf32>
    %cst_13 = arith.constant dense<0.000000e+00> : vector<8x2xf32>
    %17 = vector.multi_reduction <add>, %16, %cst_13 [2] : vector<8x2x8xf32> to vector<8x2xf32>
    %18 = tpu.transpose %17, [1, 0] : vector<8x2xf32> -> vector<2x8xf32>
    %19 = vector.shape_cast %18 : vector<2x8xf32> to vector<2x8x1xf32>
    %20 = tpu.transpose %13, [1, 0] : vector<8x2xf32> -> vector<2x8xf32>
    %21 = vector.shape_cast %20 : vector<2x8xf32> to vector<2x1x8xf32>
    %22 = vector.broadcast %19 : vector<2x8x1xf32> to vector<2x8x8xf32>
    %23 = vector.broadcast %21 : vector<2x1x8xf32> to vector<2x8x8xf32>
    %24 = arith.addf %22, %23 : vector<2x8x8xf32>
    %cst_14 = arith.constant 0.000000e+00 : f32
    %25 = vector.broadcast %cst_14 : f32 to vector<2x8x8xf32>
    %26 = arith.cmpf ogt, %24, %25 : vector<2x8x8xf32>
    %cst_15 = arith.constant 2.000000e-01 : f32
    %27 = vector.broadcast %cst_15 : f32 to vector<2x8x8xf32>
    %28 = arith.mulf %27, %24 : vector<2x8x8xf32>
    %29 = arith.select %26, %24, %28 : vector<2x8x8xi1>, vector<2x8x8xf32>
    %30 = vector.shape_cast %2 : vector<8x8xi1> to vector<1x8x8xi1>
    %cst_16 = arith.constant -1.000000e+30 : f32
    %31 = vector.shape_cast %30 : vector<1x8x8xi1> to vector<1x8x8xi1>
    %32 = vector.broadcast %31 : vector<1x8x8xi1> to vector<2x8x8xi1>
    %33 = vector.broadcast %cst_16 : f32 to vector<2x8x8xf32>
    %34 = arith.select %32, %29, %33 : vector<2x8x8xi1>, vector<2x8x8xf32>
    %cst_17 = arith.constant dense<0xFF800000> : vector<2x8xf32>
    %35 = vector.multi_reduction <maximumf>, %34, %cst_17 [2] : vector<2x8x8xf32> to vector<2x8xf32>
    %36 = vector.shape_cast %35 : vector<2x8xf32> to vector<2x8x1xf32>
    %37 = vector.shape_cast %2 : vector<8x8xi1> to vector<1x8x8xi1>
    %38 = vector.broadcast %36 : vector<2x8x1xf32> to vector<2x8x8xf32>
    %39 = arith.subf %34, %38 : vector<2x8x8xf32>
    %40 = math.exp %39 : vector<2x8x8xf32>
    %cst_18 = arith.constant 0.000000e+00 : f32
    %41 = vector.shape_cast %37 : vector<1x8x8xi1> to vector<1x8x8xi1>
    %42 = vector.broadcast %41 : vector<1x8x8xi1> to vector<2x8x8xi1>
    %43 = vector.broadcast %cst_18 : f32 to vector<2x8x8xf32>
    %44 = arith.select %42, %40, %43 : vector<2x8x8xi1>, vector<2x8x8xf32>
    %cst_19 = arith.constant dense<0.000000e+00> : vector<2x8xf32>
    %45 = vector.multi_reduction <add>, %44, %cst_19 [2] : vector<2x8x8xf32> to vector<2x8xf32>
    %46 = vector.shape_cast %45 : vector<2x8xf32> to vector<2x8x1xf32>
    %cst_20 = arith.constant 9.99999971E-10 : f32
    %47 = vector.broadcast %cst_20 : f32 to vector<2x8x1xf32>
    %48 = arith.maximumf %46, %47 : vector<2x8x1xf32>
    %49 = vector.broadcast %48 : vector<2x8x1xf32> to vector<2x8x8xf32>
    %50 = arith.divf %44, %49 : vector<2x8x8xf32>
    %51 = tpu.transpose %9, [1, 0, 2] : vector<8x2x8xf32> -> vector<2x8x8xf32>
    "tpu.trace_start"() <{level = 10 : i32, message = "hvu,hud->hvd"}> : () -> ()
    %cst_21 = arith.constant dense<0.000000e+00> : vector<2x8x8xf32>
    %52 = tpu.matmul %50, %51, %cst_21 {dimension_numbers = #tpu.dot_dimension_numbers<[2], [1], [1], [2], [0, 0, 0, 1, 1, 2], [0], [0]>} : vector<2x8x8xf32>, vector<2x8x8xf32>, vector<2x8x8xf32> -> vector<2x8x8xf32>
    "tpu.trace_stop"() : () -> ()
    %53 = tpu.transpose %52, [1, 0, 2] : vector<2x8x8xf32> -> vector<8x2x8xf32>
    %54 = vector.shape_cast %7 : vector<1x16xf32> to vector<1x2x8xf32>
    %55 = vector.broadcast %54 : vector<1x2x8xf32> to vector<8x2x8xf32>
    %56 = arith.addf %53, %55 : vector<8x2x8xf32>
    %cst_22 = arith.constant 0.000000e+00 : f32
    %57 = vector.broadcast %cst_22 : f32 to vector<8x2x8xf32>
    %58 = arith.cmpf ogt, %56, %57 : vector<8x2x8xf32>
    %cst_23 = arith.constant 0.000000e+00 : f32
    %59 = vector.broadcast %cst_23 : f32 to vector<8x2x8xf32>
    %60 = arith.minimumf %56, %59 : vector<8x2x8xf32>
    %61 = math.exp %60 : vector<8x2x8xf32>
    %cst_24 = arith.constant 1.000000e+00 : f32
    %62 = vector.broadcast %cst_24 : f32 to vector<8x2x8xf32>
    %63 = arith.subf %61, %62 : vector<8x2x8xf32>
    %64 = arith.select %58, %56, %63 : vector<8x2x8xi1>, vector<8x2x8xf32>
    %65 = vector.shape_cast %64 : vector<8x2x8xf32> to vector<8x16xf32>
    %c0_25 = arith.constant 0 : index
    %c0_26 = arith.constant 0 : index
    %66 = vector.load %arg6[%c0_25, %c0_26] : memref<16x16xf32, #tpu.memory_space<vmem>>, vector<16x16xf32>
    %c0_27 = arith.constant 0 : index
    %c0_28 = arith.constant 0 : index
    %67 = vector.load %arg7[%c0_27, %c0_28] : memref<2x8xf32, #tpu.memory_space<vmem>>, vector<2x8xf32>
    %c0_29 = arith.constant 0 : index
    %c0_30 = arith.constant 0 : index
    %68 = vector.load %arg8[%c0_29, %c0_30] : memref<2x8xf32, #tpu.memory_space<vmem>>, vector<2x8xf32>
    %c0_31 = arith.constant 0 : index
    %c0_32 = arith.constant 0 : index
    %69 = vector.load %arg9[%c0_31, %c0_32] : memref<1x16xf32, #tpu.memory_space<vmem>>, vector<1x16xf32>
    %cst_33 = arith.constant dense<0.000000e+00> : vector<8x16xf32>
    %70 = tpu.matmul %65, %66, %cst_33 {dimension_numbers = #tpu.dot_dimension_numbers<[1], [0], [0], [1], [0, 0, 1, 1], [], []>} : vector<8x16xf32>, vector<16x16xf32>, vector<8x16xf32> -> vector<8x16xf32>
    %71 = vector.shape_cast %70 : vector<8x16xf32> to vector<8x2x8xf32>
    %72 = vector.shape_cast %67 : vector<2x8xf32> to vector<1x2x8xf32>
    %73 = vector.broadcast %72 : vector<1x2x8xf32> to vector<8x2x8xf32>
    %74 = arith.mulf %71, %73 : vector<8x2x8xf32>
    %cst_34 = arith.constant dense<0.000000e+00> : vector<8x2xf32>
    %75 = vector.multi_reduction <add>, %74, %cst_34 [2] : vector<8x2x8xf32> to vector<8x2xf32>
    %76 = vector.shape_cast %68 : vector<2x8xf32> to vector<1x2x8xf32>
    %77 = vector.broadcast %76 : vector<1x2x8xf32> to vector<8x2x8xf32>
    %78 = arith.mulf %71, %77 : vector<8x2x8xf32>
    %cst_35 = arith.constant dense<0.000000e+00> : vector<8x2xf32>
    %79 = vector.multi_reduction <add>, %78, %cst_35 [2] : vector<8x2x8xf32> to vector<8x2xf32>
    %80 = tpu.transpose %79, [1, 0] : vector<8x2xf32> -> vector<2x8xf32>
    %81 = vector.shape_cast %80 : vector<2x8xf32> to vector<2x8x1xf32>
    %82 = tpu.transpose %75, [1, 0] : vector<8x2xf32> -> vector<2x8xf32>
    %83 = vector.shape_cast %82 : vector<2x8xf32> to vector<2x1x8xf32>
    %84 = vector.broadcast %81 : vector<2x8x1xf32> to vector<2x8x8xf32>
    %85 = vector.broadcast %83 : vector<2x1x8xf32> to vector<2x8x8xf32>
    %86 = arith.addf %84, %85 : vector<2x8x8xf32>
    %cst_36 = arith.constant 0.000000e+00 : f32
    %87 = vector.broadcast %cst_36 : f32 to vector<2x8x8xf32>
    %88 = arith.cmpf ogt, %86, %87 : vector<2x8x8xf32>
    %cst_37 = arith.constant 2.000000e-01 : f32
    %89 = vector.broadcast %cst_37 : f32 to vector<2x8x8xf32>
    %90 = arith.mulf %89, %86 : vector<2x8x8xf32>
    %91 = arith.select %88, %86, %90 : vector<2x8x8xi1>, vector<2x8x8xf32>
    %92 = vector.shape_cast %2 : vector<8x8xi1> to vector<1x8x8xi1>
    %cst_38 = arith.constant -1.000000e+30 : f32
    %93 = vector.shape_cast %92 : vector<1x8x8xi1> to vector<1x8x8xi1>
    %94 = vector.broadcast %93 : vector<1x8x8xi1> to vector<2x8x8xi1>
    %95 = vector.broadcast %cst_38 : f32 to vector<2x8x8xf32>
    %96 = arith.select %94, %91, %95 : vector<2x8x8xi1>, vector<2x8x8xf32>
    %cst_39 = arith.constant dense<0xFF800000> : vector<2x8xf32>
    %97 = vector.multi_reduction <maximumf>, %96, %cst_39 [2] : vector<2x8x8xf32> to vector<2x8xf32>
    %98 = vector.shape_cast %97 : vector<2x8xf32> to vector<2x8x1xf32>
    %99 = vector.shape_cast %2 : vector<8x8xi1> to vector<1x8x8xi1>
    %100 = vector.broadcast %98 : vector<2x8x1xf32> to vector<2x8x8xf32>
    %101 = arith.subf %96, %100 : vector<2x8x8xf32>
    %102 = math.exp %101 : vector<2x8x8xf32>
    %cst_40 = arith.constant 0.000000e+00 : f32
    %103 = vector.shape_cast %99 : vector<1x8x8xi1> to vector<1x8x8xi1>
    %104 = vector.broadcast %103 : vector<1x8x8xi1> to vector<2x8x8xi1>
    %105 = vector.broadcast %cst_40 : f32 to vector<2x8x8xf32>
    %106 = arith.select %104, %102, %105 : vector<2x8x8xi1>, vector<2x8x8xf32>
    %cst_41 = arith.constant dense<0.000000e+00> : vector<2x8xf32>
    %107 = vector.multi_reduction <add>, %106, %cst_41 [2] : vector<2x8x8xf32> to vector<2x8xf32>
    %108 = vector.shape_cast %107 : vector<2x8xf32> to vector<2x8x1xf32>
    %cst_42 = arith.constant 9.99999971E-10 : f32
    %109 = vector.broadcast %cst_42 : f32 to vector<2x8x1xf32>
    %110 = arith.maximumf %108, %109 : vector<2x8x1xf32>
    %111 = vector.broadcast %110 : vector<2x8x1xf32> to vector<2x8x8xf32>
    %112 = arith.divf %106, %111 : vector<2x8x8xf32>
    %113 = tpu.transpose %71, [1, 0, 2] : vector<8x2x8xf32> -> vector<2x8x8xf32>
    "tpu.trace_start"() <{level = 10 : i32, message = "hvu,hud->hvd"}> : () -> ()
    %cst_43 = arith.constant dense<0.000000e+00> : vector<2x8x8xf32>
    %114 = tpu.matmul %112, %113, %cst_43 {dimension_numbers = #tpu.dot_dimension_numbers<[2], [1], [1], [2], [0, 0, 0, 1, 1, 2], [0], [0]>} : vector<2x8x8xf32>, vector<2x8x8xf32>, vector<2x8x8xf32> -> vector<2x8x8xf32>
    "tpu.trace_stop"() : () -> ()
    %115 = tpu.transpose %114, [1, 0, 2] : vector<2x8x8xf32> -> vector<8x2x8xf32>
    %116 = vector.shape_cast %65 : vector<8x16xf32> to vector<8x2x8xf32>
    %117 = arith.addf %115, %116 : vector<8x2x8xf32>
    %118 = vector.shape_cast %69 : vector<1x16xf32> to vector<1x2x8xf32>
    %119 = vector.broadcast %118 : vector<1x2x8xf32> to vector<8x2x8xf32>
    %120 = arith.addf %117, %119 : vector<8x2x8xf32>
    %cst_44 = arith.constant dense<0.000000e+00> : vector<8x8xf32>
    %121 = vector.multi_reduction <add>, %120, %cst_44 [1] : vector<8x2x8xf32> to vector<8x8xf32>
    %cst_45 = arith.constant 2.000000e+00 : f32
    %122 = vector.broadcast %cst_45 : f32 to vector<8x8xf32>
    %123 = arith.divf %121, %122 : vector<8x8xf32>
    %c0_46 = arith.constant 0 : index
    %c0_47 = arith.constant 0 : index
    %124 = vector.load %arg10[%c0_46, %c0_47] : memref<8x8xf32, #tpu.memory_space<vmem>>, vector<8x8xf32>
    tpu.vector_store %arg10[%c0_46, %c0_47], %123 {strides = array<i32>} : memref<8x8xf32, #tpu.memory_space<vmem>>, vector<8x8xf32>,
    return
  }
}

</mosaic_0001>

<bundles_post_ra>
// kernel: _lambda_.1
= control target key start
LH: loop header
LB: loop body
LE: loop exit
PB: predicated region body
PF: predicated region fallthrough
CT: control target
= control target key end

     0   :  { %15 = vsyncpa [#allocation3], 0  ;;  %s2500_s0 = inlined_call_operand.hbm [shape: f32[8,8], index: 0, kind: input, shape index: {}]   ;;  %s2501_s1 = inlined_call_operand.hbm [shape: f32[8,8], index: 1, kind: input, shape index: {}]   ;;  %s2502_s2 = inlined_call_operand.vmem [shape: f32[8,16], index: 2, kind: input, shape index: {}]   ;;  %s2503_s3 = inlined_call_operand.hbm [shape: f32[2,8], index: 3, kind: input, shape index: {}]   ;;  %s2504_s4 = inlined_call_operand.hbm [shape: f32[2,8], index: 4, kind: input, shape index: {}]   ;;  %s2505_s5 = inlined_call_operand.vmem [shape: f32[1,16], index: 5, kind: input, shape index: {}, may-alias: {5,9}]   ;;  %s2506_s6 = inlined_call_operand.vmem [shape: f32[16,16], index: 6, kind: input, shape index: {}]   ;;  %s2507_s7 = inlined_call_operand.vmem [shape: f32[2,8], index: 7, kind: input, shape index: {}]   ;;  %s2508_s8 = inlined_call_operand.vmem [shape: f32[2,8], index: 8, kind: input, shape index: {}]   ;;  %s2509_s9 = inlined_call_operand.vmem [shape: f32[1,16], index: 9, kind: input, shape index: {}, may-alias: {5,9}]   ;;  %s2510_s10 = inlined_call_operand.hbm [shape: f32[8,8], index: 10, kind: output, shape index: {}]  }
   0x1   :  { %16 = vsyncpa [#allocation6], 0 }
   0x2   :  { %17 = vsyncpa [#allocation9], 0 }
   0x3   :  { %18 = vsyncpa [#allocation4], 0  ;;  %s2026_s13 = smov [#allocation5]   ;;  %s2027_s15 = smov [#allocation2]  }
   0x4   :  { %s35_s14 = sshll.u32 %s2026_s13, 4  ;;  %s25_s16 = sshll.u32 %s2027_s15, 4  ;;  %s36_s14 = int_to_ptr.vmem [resolvable:$true] %s35_s14  ;;  %s26_s16 = int_to_ptr.vmem [resolvable:$true] %s25_s16 }
   0x5   :  { %s1908_s19 = scalar_lea.hbm %s2501_s1, 128 }
   0x6   :  { %p1909_p0 = scmp.ne.s32.totalorder %s2501_s1, %s1908_s19  ;;  %p1912_p1 = scmp.lt.u32.totalorder %s1908_s19, %s2501_s1 }
   0x8   :  { %p1914_p2 = pnand %p1912_p1, %p1909_p0 }
   0xa   :  { %1917 = shalt.err (!%p1914_p2)
}
   0xb   :  { %s1918_s24 = scalar_lea.vmem %s36_s14, 128  ;;  %p1923_p4 = scmp.lt.s32.totalorder %s36_s14, %s36_s14 }
   0xc   :  { %p1919_p3 = scmp.ne.s32.totalorder %s36_s14, %s1918_s24  ;;  %p1924_p5 = scmp.lt.s32.totalorder %s1918_s24, %s1918_s24 }
   0xe   :  { %p1925_p6 = por %p1924_p5, %p1923_p4 }
  0x10   :  { %p1926_p7 = pnand %p1925_p6, %p1919_p3 }
  0x12   :  { %1929 = shalt.err (!%p1926_p7)
}
  0x13   :  { %38 = dma.hbm_to_vmem [thread:$0]  %s2501_s1, 128, %s36_s14, [#allocation6]  }
  0x14   :  { %s1930_s29 = scalar_lea.hbm %s2500_s0, 128 }
  0x15   :  { %p1931_p8 = scmp.ne.s32.totalorder %s2500_s0, %s1930_s29  ;;  %p1934_p9 = scmp.lt.u32.totalorder %s1930_s29, %s2500_s0 }
  0x17   :  { %p1936_p10 = pnand %p1934_p9, %p1931_p8 }
  0x19   :  { %1939 = shalt.err (!%p1936_p10)
}
  0x1a   :  { %s1940_s15 = scalar_lea.vmem %s26_s16, 128  ;;  %p1945_p12 = scmp.lt.s32.totalorder %s26_s16, %s26_s16 }
  0x1b   :  { %p1941_p11 = scmp.ne.s32.totalorder %s26_s16, %s1940_s15  ;;  %p1946_p13 = scmp.lt.s32.totalorder %s1940_s15, %s1940_s15 }
  0x1d   :  { %p1947_p0 = por %p1946_p13, %p1945_p12 }
  0x1f   :  { %p1948_p1 = pnand %p1947_p0, %p1941_p11 }
  0x21   :  { %1951 = shalt.err (!%p1948_p1)
}
  0x22   :  { %28 = dma.hbm_to_vmem [thread:$0]  %s2500_s0, 128, %s26_s16, [#allocation3]  }
  0x23   :  { %s2028_s17 = smov [#allocation7]   ;;  %s2029_s19 = smov [#allocation8]  }
  0x24   :  { %s47_s18 = sshll.u32 %s2028_s17, 4  ;;  %s57_s20 = sshll.u32 %s2029_s19, 4  ;;  %s48_s18 = int_to_ptr.vmem [resolvable:$true] %s47_s18  ;;  %s58_s20 = int_to_ptr.vmem [resolvable:$true] %s57_s20 }
  0x25   :  { %s1952_s23 = scalar_lea.hbm %s2503_s3, 32 }
  0x26   :  { %p1953_p2 = scmp.ne.s32.totalorder %s2503_s3, %s1952_s23  ;;  %p1956_p3 = scmp.lt.u32.totalorder %s1952_s23, %s2503_s3 }
  0x28   :  { %p1958_p4 = pnand %p1956_p3, %p1953_p2 }
  0x2a   :  { %1961 = shalt.err (!%p1958_p4)
}
  0x2b   :  { %s1962_s0 = scalar_lea.vmem %s48_s18, 32  ;;  %p1967_p6 = scmp.lt.s32.totalorder %s48_s18, %s48_s18 }
  0x2c   :  { %p1963_p5 = scmp.ne.s32.totalorder %s48_s18, %s1962_s0  ;;  %p1968_p7 = scmp.lt.s32.totalorder %s1962_s0, %s1962_s0 }
  0x2e   :  { %p1969_p8 = por %p1968_p7, %p1967_p6 }
  0x30   :  { %p1970_p9 = pnand %p1969_p8, %p1963_p5 }
  0x32   :  { %1973 = shalt.err (!%p1970_p9)
}
  0x33   :  { %50 = dma.hbm_to_vmem [thread:$0]  %s2503_s3, 32, %s48_s18, [#allocation6]  }
  0x34   :  { %s1974_s11 = scalar_lea.hbm %s2504_s4, 32 }
  0x35   :  { %p1975_p10 = scmp.ne.s32.totalorder %s2504_s4, %s1974_s11  ;;  %p1978_p11 = scmp.lt.u32.totalorder %s1974_s11, %s2504_s4 }
  0x37   :  { %p1980_p12 = pnand %p1978_p11, %p1975_p10 }
  0x39   :  { %1983 = shalt.err (!%p1980_p12)
}
  0x3a   :  { %s1984_s14 = scalar_lea.vmem %s58_s20, 32  ;;  %p1989_p0 = scmp.lt.s32.totalorder %s58_s20, %s58_s20 }
  0x3b   :  { %p1985_p13 = scmp.ne.s32.totalorder %s58_s20, %s1984_s14  ;;  %p1990_p1 = scmp.lt.s32.totalorder %s1984_s14, %s1984_s14 }
  0x3d   :  { %p1991_p2 = por %p1990_p1, %p1989_p0 }
  0x3f   :  { %p1992_p3 = pnand %p1991_p2, %p1985_p13 }
  0x41   :  { %1995 = shalt.err (!%p1992_p3)
}
  0x42   :  { %60 = dma.hbm_to_vmem [thread:$0]  %s2504_s4, 32, %s58_s20, [#allocation9]  }
  0x43   :  { %2018 = dma.done.wait [#allocation3], 128  }
  0x44   :  { %2019 = vsyncadd [#allocation3], 4294967168 }
  0x45   :  { %2020 = dma.done.wait [#allocation6], 160  }
  0x46   :  { %2021 = vsyncadd [#allocation6], 4294967136 }
  0x47   :  { %2022 = dma.done.wait [#allocation9], 32  }
  0x48   :  { %2023 = vsyncadd [#allocation9], 4294967264  ;;  %v2030_v0 = vmov 0.0   ;;  %vm2031_vm0 = vmmov 0   ;;  %vm90_vm1 = vcmask 64512   ;;  %v86_v1 = vld [vmem:[%s2502_s2] sm:$0xff]  ;;  %v172_v7 = vlaneseq }
  0x49   :  { %1828 = vmatprep.subr.mxu0 %v2030_v0  ;;  %1830 = vmatprep.mubr.msk.f32.mxu0 %vm2031_vm0, %v2030_v0  ;;  %v85_v2 = vld [vmem:[#allocation2] sm:$0xff]  ;;  %s2032_s19 = smov 120   ;;  %v2033_v5 = vmov 1983009808   ;;  %v2034_v10 = vmov 1934713408  }
  0x4a   :  { %1833 = vmatprep.subr.mxu1 %v2030_v0  ;;  %1835 = vmatprep.mubr.msk.f32.mxu1 %vm2031_vm0, %v2030_v0  ;;  %v170_v6 = vunpack.c.l.s4 %v2033_v5  ;;  %v2157_v9 = vshrl.u32 %v172_v7, 7  ;;  %v201_v11 = vunpack.c.l.s4 %v2034_v10  ;;  %v88_v24 = vld [vmem:[#allocation8] sm:$0x3]  ;;  %v2173_v29 = vld [vmem:[#allocation7] sm:$0x3]  ;;  %vm242_vm2 = vcmask 58368  }
  0x4b   :  { %1829 = vmatpush3.msra.mxu0 %v86_v1  ;;  %vm341_vm3 = vcmask 1041409   ;;  %vm343_vm4 = vcmask 1042434   ;;  %vm345_vm5 = vcmask 1043459   ;;  %vm347_vm6 = vcmask 1044484  }
  0x4c   :  { %1831 = vmatmul.mubr.msk.f32.vlgmr.msra.gmra.mrb[0].mxu0 %vm90_vm1, %v85_v2  ;;  %1838 = vmatprep.subr.mxu0 %v2030_v0  ;;  %v171_v8 = vunpack.c.0.s8 %v170_v6  ;;  %v202_v13 = vunpack.c.0.s8 %v201_v11  ;;  %vm349_vm7 = vcmask 1045509   ;;  %vm351_vm8 = vcmask 1046534  }
  0x4d   :  { %1840 = vmatprep.mubr.msk.f32.mxu0 %vm2031_vm0, %v2030_v0  ;;  %vm353_vm9 = vcmask 1047559  }
  0x4e   :  { %v2160_v12 = vsub.s32 %v171_v8, %v2157_v9  ;;  %v2165_v17 = vsub.s32 %v202_v13, %v2157_v9 }
 0x11f   :  { %v160_v3 = vpop.f32.mrb[0].mxu0 }
 0x120   :  { %165 = vrot.lane.b32.xlu0 %v160_v3, %s2032_s19  ;;  %v1832_v4 = vpop.f32.mrb[1].mxu0  ;;  %v168_v14 = vcombine.high %v160_v3, %v2030_v0  ;;  %v175_v16 = vrot.slane %v160_v3, %v2160_v12 }
 0x122   :  { %v182_v20 = vrot.slane %v168_v14, %v2160_v12 }
 0x192   :  { %v166_v15 = vpop.permute.xlu0 %165 }
 0x193   :  { %v183_v18 = vcombine.high %v166_v15, %v2030_v0  ;;  %v190_v19 = vrot.slane %v166_v15, %v2160_v12 }
 0x195   :  { %v197_v21 = vrot.slane %v183_v18, %v2160_v12  ;;  %v198_v22 = vcombine.low %v175_v16, %v190_v19  ;;  %v199_v23 = vcombine.high %v175_v16, %v190_v19 }
 0x197   :  { %v206_v25 = vrot.slane %v198_v22, %v2165_v17  ;;  %v213_v26 = vrot.slane %v199_v23, %v2165_v17  ;;  %v214_v27 = vcombine.low %v182_v20, %v197_v21  ;;  %v215_v28 = vcombine.high %v182_v20, %v197_v21 }
 0x199   :  { %v222_v30 = vrot.slane %v214_v27, %v2165_v17  ;;  %v229_v31 = vrot.slane %v215_v28, %v2165_v17  ;;  %v269_v32 = vmul.f32 %v213_v26, %v88_v24  ;;  %v267_v33 = vmul.f32 %v206_v25, %v88_v24 }
 0x19a   :  { %v236_v34 = vmul.f32 %v213_v26, %v2173_v29  ;;  %v230_v35 = vcombine.high %v206_v25, %v2030_v0  ;;  %v231_v36 = vcombine.high %v213_v26, %v2030_v0  ;;  %v553_v37 = vcombine.low %v206_v25, %v213_v26 }
 0x19b   :  { %v281_v38 = vsel %vm242_vm2, %v269_v32, 0.0  ;;  %v275_v39 = vsel %vm242_vm2, %v267_v33, 0.0  ;;  %v1798_v40 = vcombine.high %v206_v25, %v213_v26  ;;  %v569_v44 = vcombine.low %v222_v30, %v229_v31 }
 0x19c   :  { %282 = vadd.xlane.f32.xlu1 %v281_v38  ;;  %276 = vadd.xlane.f32.xlu0 %v275_v39  ;;  %v268_v41 = vmul.f32 %v230_v35, %v88_v24  ;;  %v560_v42 = vrot.slane %v553_v37, %v2160_v12  ;;  %v1799_v45 = vcombine.high %v222_v30, %v229_v31  ;;  %v249_v46 = vsel %vm242_vm2, %v236_v34, 0.0 }
 0x19d   :  { %v568_v43 = vrot.slane %v1798_v40, %v2160_v12  ;;  %v270_v47 = vmul.f32 %v231_v36, %v88_v24  ;;  %v238_v48 = vmul.f32 %v222_v30, %v2173_v29  ;;  %v576_v50 = vrot.slane %v569_v44, %v2160_v12 }
 0x19e   :  { %v278_v49 = vsel %vm242_vm2, %v268_v41, 0.0  ;;  %v584_v51 = vrot.slane %v1799_v45, %v2160_v12  ;;  %v271_v58 = vmul.f32 %v222_v30, %v88_v24  ;;  %v240_v59 = vmul.f32 %v229_v31, %v2173_v29 }
 0x19f   :  { %v585_v52 = vcombine.low %v560_v42, %v568_v43  ;;  %v284_v54 = vsel %vm242_vm2, %v270_v47, 0.0  ;;  %v255_v55 = vsel %vm242_vm2, %v238_v48, 0.0  ;;  %v273_v1 = vmul.f32 %v229_v31, %v88_v24 }
 0x1a0   :  { %250 = vadd.xlane.f32.xlu0 %v249_v46  ;;  %279 = vadd.xlane.f32.xlu1 %v278_v49  ;;  %v593_v53 = vcombine.low %v576_v50, %v584_v51  ;;  %v287_v62 = vsel %vm242_vm2, %v271_v58, 0.0  ;;  %v261_v63 = vsel %vm242_vm2, %v240_v59, 0.0  ;;  %v232_v2 = vcombine.high %v222_v30, %v2030_v0 }
 0x1a1   :  { %v592_v56 = vrot.slane %v585_v52, %v2165_v17  ;;  %v293_v3 = vsel %vm242_vm2, %v273_v1, 0.0  ;;  %v233_v5 = vcombine.high %v229_v31, %v2030_v0  ;;  %v234_v11 = vmul.f32 %v206_v25, %v2173_v29 }
 0x1a2   :  { %v600_v57 = vrot.slane %v593_v53, %v2165_v17  ;;  %v272_v4 = vmul.f32 %v232_v2, %v88_v24  ;;  %v235_v14 = vmul.f32 %v230_v35, %v2173_v29  ;;  %v237_v16 = vmul.f32 %v231_v36, %v2173_v29 }
 0x1a3   :  { %v274_v8 = vmul.f32 %v233_v5, %v88_v24  ;;  %v243_v13 = vsel %vm242_vm2, %v234_v11, 0.0  ;;  %v239_v19 = vmul.f32 %v232_v2, %v2173_v29  ;;  %v241_v21 = vmul.f32 %v233_v5, %v2173_v29 }
 0x1a4   :  { %285 = vadd.xlane.f32.xlu1 %v284_v54  ;;  %256 = vadd.xlane.f32.xlu0 %v255_v55  ;;  %v601_v60 = vcombine.low %v592_v56, %v600_v57  ;;  %v602_v61 = vcombine.high %v592_v56, %v600_v57  ;;  %v290_v6 = vsel %vm242_vm2, %v272_v4, 0.0  ;;  %v246_v15 = vsel %vm242_vm2, %v235_v14, 0.0 }
 0x1a5   :  { %v296_v10 = vsel %vm242_vm2, %v274_v8, 0.0  ;;  %v252_v18 = vsel %vm242_vm2, %v237_v16, 0.0  ;;  %v258_v20 = vsel %vm242_vm2, %v239_v19, 0.0  ;;  %v264_v22 = vsel %vm242_vm2, %v241_v21, 0.0 }
 0x1a6   :  { %1834 = vmatpush3.msra.mxu1 %v601_v60  ;;  %1839 = vmatpush3.msra.mxu0 %v602_v61  ;;  %v308_v25 = vand.u32 127, %v172_v7  ;;  %v2232_v50 = vsub.s32 0, %v2157_v9  ;;  %v397_v53 = vsub.s32 1, %v2157_v9 }
 0x1a7   :  { %1850 = vmatprep.subr.mxu0 %v2030_v0 }
 0x1a8   :  { %288 = vadd.xlane.f32.xlu1 %v287_v62  ;;  %262 = vadd.xlane.f32.xlu0 %v261_v63  ;;  %v2214_v27 = vsub.s32 %v308_v25, %v2157_v9 }
 0x1ac   :  { %294 = vadd.xlane.f32.xlu1 %v293_v3 }
 0x1b0   :  { %291 = vadd.xlane.f32.xlu1 %v290_v6 }
 0x1b4   :  { %297 = vadd.xlane.f32.xlu1 %v296_v10 }
 0x1b8   :  { %244 = vadd.xlane.f32.xlu1 %v243_v13 }
 0x1bc   :  { %247 = vadd.xlane.f32.xlu1 %v246_v15  ;;  %v2035_v15 = vmov 1966171168  }
 0x1bd   :  { %v484_v16 = vunpack.c.l.s4 %v2035_v15 }
 0x1bf   :  { %v485_v19 = vunpack.c.0.s8 %v484_v16 }
 0x1c0   :  { %253 = vadd.xlane.f32.xlu1 %v252_v18 }
 0x1c1   :  { %v2254_v21 = vsub.s32 %v485_v19, %v2157_v9 }
 0x1c4   :  { %259 = vadd.xlane.f32.xlu1 %v258_v20 }
 0x1c8   :  { %265 = vadd.xlane.f32.xlu1 %v264_v22 }
 0x229   :  { %v283_v23 = vpop.xlane.xlu1 %282  ;;  %v277_v28 = vpop.xlane.xlu0 %276 }
 0x22a   :  { %v312_v32 = vrot.slane %v277_v28, %v2214_v27  ;;  %v320_v35 = vrot.slane %v283_v23, %v2214_v27 }
 0x22d   :  { %v280_v24 = vpop.xlane.xlu1 %279  ;;  %v251_v47 = vpop.xlane.xlu0 %250 }
 0x22e   :  { %v316_v31 = vrot.slane %v280_v24, %v2214_v27  ;;  %v421_v63 = vrot.slane %v251_v47, %v2214_v27 }
 0x230   :  { %v342_v33 = vsel %vm341_vm3, %v316_v31, %v312_v32 }
 0x231   :  { %v286_v26 = vpop.xlane.xlu1 %285  ;;  %v344_v36 = vsel %vm343_vm4, %v320_v35, %v342_v33  ;;  %v257_v48 = vpop.xlane.xlu0 %256 }
 0x232   :  { %v324_v34 = vrot.slane %v286_v26, %v2214_v27  ;;  %v429_v4 = vrot.slane %v257_v48, %v2214_v27 }
 0x234   :  { %v346_v38 = vsel %vm345_vm5, %v324_v34, %v344_v36 }
 0x235   :  { %v289_v30 = vpop.xlane.xlu1 %288  ;;  %v263_v49 = vpop.xlane.xlu0 %262 }
 0x236   :  { %v328_v7 = vrot.slane %v289_v30, %v2214_v27  ;;  %v437_v11 = vrot.slane %v263_v49, %v2214_v27  ;;  %v2260_v30 = vld [vmem:[#allocation5] sm:$0xff] }
 0x237   :  { %vm2511_vm10 = vcmp.gt.f32.partialorder %v2260_v30, 0.0 }
 0x238   :  { %v348_v40 = vsel %vm347_vm6, %v328_v7, %v346_v38 }
 0x239   :  { %v295_v29 = vpop.xlane.xlu1 %294 }
 0x23a   :  { %v336_v42 = vrot.slane %v295_v29, %v2214_v27 }
 0x23d   :  { %v292_v37 = vpop.xlane.xlu1 %291 }
 0x23e   :  { %v332_v39 = vrot.slane %v292_v37, %v2214_v27 }
 0x240   :  { %v350_v41 = vsel %vm349_vm7, %v332_v39, %v348_v40 }
 0x241   :  { %v298_v43 = vpop.xlane.xlu1 %297  ;;  %v352_v45 = vsel %vm351_vm8, %v336_v42, %v350_v41 }
 0x242   :  { %v340_v44 = vrot.slane %v298_v43, %v2214_v27 }
 0x244   :  { %v354_v46 = vsel %vm353_vm9, %v340_v44, %v352_v45 }
 0x245   :  { %356 = vxpose.xlu0.b32.start.end [1/1] (short) (narrow) %v354_v46, 8  ;;  %v245_v55 = vpop.xlane.xlu1 %244 }
 0x246   :  { %v413_v59 = vrot.slane %v245_v55, %v2214_v27 }
 0x249   :  { %v248_v56 = vpop.xlane.xlu1 %247 }
 0x24a   :  { %v417_v58 = vrot.slane %v248_v56, %v2214_v27 }
 0x24c   :  { %v442_v61 = vsel %vm341_vm3, %v417_v58, %v413_v59 }
 0x24d   :  { %v254_v57 = vpop.xlane.xlu1 %253  ;;  %v443_v1 = vsel %vm343_vm4, %v421_v63, %v442_v61  ;;  %v945_v63 = vld [vmem:[%s2506_s6] sm:$0xff] }
 0x24e   :  { %v425_v62 = vrot.slane %v254_v57, %v2214_v27 }
 0x250   :  { %v444_v2 = vsel %vm345_vm5, %v425_v62, %v443_v1  ;;  %v946_v1 = vld [vmem:[%s2506_s6 + $0x8] sm:$0xff]  ;;  %s2037_s6 = smov 8  }
 0x251   :  { %v260_v60 = vpop.xlane.xlu1 %259  ;;  %v445_v6 = vsel %vm347_vm6, %v429_v4, %v444_v2  ;;  %v2036_v2 = vmov 0.0|0.0  }
 0x252   :  { %v433_v3 = vrot.slane %v260_v60, %v2214_v27  ;;  %1860 = vmatprep.subr.bf16.mxu1 %v2036_v2 }
 0x254   :  { %v446_v10 = vsel %vm349_vm7, %v433_v3, %v445_v6  ;;  %v1861_v3 = vpack.c.bf16 %v946_v1, %v945_v63 }
 0x255   :  { %v266_v5 = vpop.xlane.xlu1 %265  ;;  %v447_v13 = vsel %vm351_vm8, %v437_v11, %v446_v10 }
 0x256   :  { %v441_v8 = vrot.slane %v266_v5, %v2214_v27 }
 0x258   :  { %v448_v14 = vsel %vm353_vm9, %v441_v8, %v447_v13 }
 0x2c5   :  { %v372_v51 = vpop.trf.xlu0 }
 0x2c6   :  { %v391_v52 = vrot.slane %v372_v51, %v2232_v50  ;;  %v398_v54 = vrot.slane %v372_v51, %v397_v53 }
 0x2c8   :  { %393 = vbcast.lane.b32.xlu1 %v391_v52, 256 }
 0x2cc   :  { %400 = vbcast.lane.b32.xlu1 %v398_v54, 256  ;;  %v89_v54 = vld [vmem:[%s2505_s5] sm:$0x1] }
 0x2f5   :  { %450 = vxpose.xlu1.b32.start.end [1/1] (short) (narrow) %v448_v14, 8 }
 0x33a   :  { %v394_v18 = vpop.permute.xlu1 %393 }
 0x33e   :  { %v401_v20 = vpop.permute.xlu1 %400 }
 0x375   :  { %v466_v22 = vpop.trf.xlu1 }
 0x376   :  { %v489_v23 = vrot.slane %v466_v22, %v2254_v21 }
 0x378   :  { %v490_v24 = vcombine.high %v489_v23, %v489_v23  ;;  %v497_v25 = vrot.slane %v489_v23, %v2254_v21 }
 0x37a   :  { %v504_v26 = vrot.slane %v490_v24, %v2254_v21  ;;  %v508_v28 = vrot.slane %v497_v25, %v2232_v50 }
 0x37c   :  { %v512_v31 = vrot.slane %v504_v26, %v2232_v50  ;;  %v515_v32 = vadd.f32 %v508_v28, %v394_v18 }
 0x37e   :  { %vm517_vm11 = vcmp.gt.f32.partialorder %v515_v32, 0.0  ;;  %v519_v29 = vmul.f32 0.2, %v515_v32  ;;  %v516_v33 = vadd.f32 %v512_v31, %v401_v20 }
 0x380   :  { %v521_v34 = vsel %vm517_vm11, %v515_v32, %v519_v29  ;;  %vm518_vm12 = vcmp.gt.f32.partialorder %v516_v33, 0.0  ;;  %v520_v35 = vmul.f32 0.2, %v516_v33 }
 0x381   :  { %v525_v7 = vsel %vm2511_vm10, %v521_v34, -1e+30 }
 0x382   :  { %v527_v36 = vsel %vm90_vm1, %v525_v7, -inf  ;;  %v522_v37 = vsel %vm518_vm12, %v516_v33, %v520_v35 }
 0x383   :  { %528 = vmax.xlane.f32.xlu0 %v527_v36  ;;  %v526_v38 = vsel %vm2511_vm10, %v522_v37, -1e+30 }
 0x384   :  { %v530_v39 = vsel %vm90_vm1, %v526_v38, -inf }
 0x385   :  { %531 = vmax.xlane.f32.xlu1 %v530_v39 }
 0x410   :  { %v529_v40 = vpop.xlane.xlu0 %528 }
 0x411   :  { %v533_v41 = vsub.f32 %v525_v7, %v529_v40 }
 0x412   :  { %v532_v42 = vpop.xlane.xlu1 %531 }
 0x413   :  { %v535_v43 = vmul.f32 1.442695, %v533_v41  ;;  %v534_v44 = vsub.f32 %v526_v38, %v532_v42 }
 0x415   :  { %1876 = vpow2.f32 %v535_v43  ;;  %v537_v45 = vmul.f32 1.442695, %v534_v44 }
 0x417   :  { %1878 = vpow2.f32 %v537_v45 }
 0x41f   :  { %v1877_v46 = vpop.eup %1876 }
 0x420   :  { %v539_v47 = vsel %vm2511_vm10, %v1877_v46, 0.0 }
 0x421   :  { %v1879_v48 = vpop.eup %1878  ;;  %v541_v49 = vsel %vm90_vm1, %v539_v47, 0.0 }
 0x422   :  { %542 = vadd.xlane.f32.xlu0 %v541_v49  ;;  %v540_v51 = vsel %vm2511_vm10, %v1879_v48, 0.0 }
 0x423   :  { %v544_v52 = vsel %vm90_vm1, %v540_v51, 0.0 }
 0x426   :  { %545 = vadd.xlane.f32.xlu0 %v544_v52 }
 0x43c   :  { %816 = vrot.lane.b32.xlu0 %v89_v54, %s2032_s19 }
 0x4af   :  { %v543_v55 = vpop.xlane.xlu0 %542 }
 0x4b0   :  { %v547_v56 = vmax.f32 %v543_v55, 1e-09 }
 0x4b2   :  { %1880 = vrcp.f32 %v547_v56 }
 0x4b3   :  { %v546_v57 = vpop.xlane.xlu0 %545 }
 0x4b4   :  { %v548_v58 = vmax.f32 %v546_v57, 1e-09 }
 0x4b6   :  { %1882 = vrcp.f32 %v548_v58 }
 0x4b7   :  { %v817_v4 = vpop.permute.xlu0 %816 }
 0x4b8   :  { %v818_v6 = vcombine.low %v89_v54, %v817_v4 }
 0x4ba   :  { %v825_v13 = vrot.slane %v818_v6, %v2254_v21 }
 0x4bc   :  { %v1881_v59 = vpop.eup %1880  ;;  %v832_v24 = vrot.slane %v825_v13, %v2254_v21 }
 0x4bd   :  { %v550_v60 = vmul.f32 %v1881_v59, %v539_v47 }
 0x4bf   :  { %1836 = vmatmul.mubr.msk.f32.vlgmr.msra.gmra.mrb[0].mxu1 %vm90_vm1, %v550_v60 }
 0x4c0   :  { %v1883_v61 = vpop.eup %1882  ;;  %1847 = vmatprep.mubr.msk.f32.mxu1 %vm2031_vm0, %v2030_v0  ;;  %1862 = vmatpush3.bf16.msra.mxu1 %v1861_v3 }
 0x4c1   :  { %v552_v62 = vmul.f32 %v1883_v61, %v540_v51  ;;  %1855 = vmatprep.subr.mxu1 %v2030_v0 }
 0x4c3   :  { %1841 = vmatmul.mubr.msk.f32.vlgmr.msra.gmra.mrb[2].mxu0 %vm90_vm1, %v552_v62 }
 0x4c4   :  { %1852 = vmatprep.mubr.msk.f32.mxu0 %vm2031_vm0, %v2030_v0 }
 0x592   :  { %v672_v5 = vpop.f32.mrb[0].mxu1 }
 0x593   :  { %v1837_v8 = vpop.f32.mrb[1].mxu1  ;;  %v749_v10 = vcombine.high %v672_v5, %v2030_v0  ;;  %v756_v14 = vrot.slane %v672_v5, %v2160_v12 }
 0x595   :  { %v763_v19 = vrot.slane %v749_v10, %v2160_v12 }
 0x596   :  { %v745_v11 = vpop.f32.mrb[2].mxu0 }
 0x597   :  { %v764_v15 = vcombine.high %v745_v11, %v2030_v0  ;;  %v771_v16 = vrot.slane %v745_v11, %v2160_v12  ;;  %v1842_v18 = vpop.f32.mrb[3].mxu0 }
 0x599   :  { %v778_v20 = vrot.slane %v764_v15, %v2160_v12  ;;  %v779_v22 = vcombine.low %v756_v14, %v771_v16  ;;  %v780_v23 = vcombine.high %v756_v14, %v771_v16 }
 0x59b   :  { %v787_v25 = vrot.slane %v779_v22, %v2165_v17  ;;  %v794_v26 = vrot.slane %v780_v23, %v2165_v17  ;;  %v795_v28 = vcombine.low %v763_v19, %v778_v20  ;;  %v796_v31 = vcombine.high %v763_v19, %v778_v20 }
 0x59d   :  { %v803_v32 = vrot.slane %v795_v28, %v2165_v17  ;;  %v810_v29 = vrot.slane %v796_v31, %v2165_v17  ;;  %v811_v33 = vcombine.high %v787_v25, %v2030_v0  ;;  %v812_v34 = vcombine.high %v794_v26, %v2030_v0 }
 0x59e   :  { %v834_v35 = vadd.f32 %v832_v24, %v787_v25  ;;  %v836_v7 = vadd.f32 %v832_v24, %v794_v26 }
 0x59f   :  { %v813_v36 = vcombine.high %v803_v32, %v2030_v0  ;;  %v814_v37 = vcombine.high %v810_v29, %v2030_v0  ;;  %v835_v38 = vadd.f32 %v832_v24, %v811_v33  ;;  %v837_v39 = vadd.f32 %v832_v24, %v812_v34 }
 0x5a0   :  { %v838_v40 = vadd.f32 %v832_v24, %v803_v32  ;;  %v840_v41 = vadd.f32 %v832_v24, %v810_v29  ;;  %v850_v44 = vmin.f32 %v834_v35, 0.0  ;;  %v852_v46 = vmin.f32 %v836_v7, 0.0 }
 0x5a1   :  { %v839_v42 = vadd.f32 %v832_v24, %v813_v36  ;;  %v841_v43 = vadd.f32 %v832_v24, %v814_v37  ;;  %v851_v45 = vmin.f32 %v835_v38, 0.0  ;;  %v853_v47 = vmin.f32 %v837_v39, 0.0 }
 0x5a2   :  { %v854_v48 = vmin.f32 %v838_v40, 0.0  ;;  %v856_v51 = vmin.f32 %v840_v41, 0.0  ;;  %v858_v52 = vmul.f32 1.442695, %v850_v44  ;;  %v862_v55 = vmul.f32 1.442695, %v852_v46 }
 0x5a3   :  { %v855_v49 = vmin.f32 %v839_v42, 0.0  ;;  %v860_v54 = vmul.f32 1.442695, %v851_v45  ;;  %v857_v56 = vmin.f32 %v841_v43, 0.0  ;;  %v864_v57 = vmul.f32 1.442695, %v853_v47 }
 0x5a4   :  { %1884 = vpow2.f32 %v858_v52  ;;  %v866_v58 = vmul.f32 1.442695, %v854_v48  ;;  %v870_v60 = vmul.f32 1.442695, %v856_v51  ;;  %vm842_vm13 = vcmp.gt.f32.partialorder %v834_v35, 0.0 }
 0x5a5   :  { %1886 = vpow2.f32 %v860_v54  ;;  %v868_v59 = vmul.f32 1.442695, %v855_v49  ;;  %v872_v61 = vmul.f32 1.442695, %v857_v56  ;;  %vm843_vm14 = vcmp.gt.f32.partialorder %v835_v38, 0.0 }
 0x5a6   :  { %1888 = vpow2.f32 %v862_v55  ;;  %vm844_vm15 = vcmp.gt.f32.partialorder %v836_v7, 0.0  ;;  %vm845_vm11 = vcmp.gt.f32.partialorder %v837_v39, 0.0  ;;  %vm846_vm12 = vcmp.gt.f32.partialorder %v838_v40, 0.0 }
 0x5a7   :  { %1890 = vpow2.f32 %v864_v57  ;;  %vm847_vm10 = vcmp.gt.f32.partialorder %v839_v42, 0.0 }
 0x5a8   :  { %1892 = vpow2.f32 %v866_v58  ;;  %v948_v58 = vld [vmem:[%s2508_s8] sm:$0x3] }
 0x5a9   :  { %1894 = vpow2.f32 %v868_v59 }
 0x5aa   :  { %1896 = vpow2.f32 %v870_v60 }
 0x5ab   :  { %1898 = vpow2.f32 %v872_v61 }
 0x5ae   :  { %v1885_v62 = vpop.eup %1884 }
 0x5af   :  { %v1887_v63 = vpop.eup %1886  ;;  %v1802_v1 = vadd.f32 -1.0, %v1885_v62 }
 0x5b0   :  { %v1889_v2 = vpop.eup %1888  ;;  %v1803_v3 = vadd.f32 -1.0, %v1887_v63 }
 0x5b1   :  { %v1891_v4 = vpop.eup %1890  ;;  %v1804_v5 = vadd.f32 -1.0, %v1889_v2  ;;  %v2309_v10 = vsel %vm842_vm13, %v834_v35, %v1802_v1  ;;  %vm848_vm13 = vcmp.gt.f32.partialorder %v840_v41, 0.0 }
 0x5b2   :  { %v1893_v6 = vpop.eup %1892  ;;  %v1805_v8 = vadd.f32 -1.0, %v1891_v4  ;;  %v2311_v11 = vsel %vm843_vm14, %v835_v38, %v1803_v3  ;;  %vm849_vm14 = vcmp.gt.f32.partialorder %v841_v43, 0.0 }
 0x5b3   :  { %v1895_v13 = vpop.eup %1894  ;;  %v1806_v14 = vadd.f32 -1.0, %v1893_v6  ;;  %v2313_v15 = vsel %vm844_vm15, %v836_v7, %v1804_v5 }
 0x5b4   :  { %v1897_v16 = vpop.eup %1896  ;;  %v1807_v18 = vadd.f32 -1.0, %v1895_v13  ;;  %v2315_v19 = vsel %vm845_vm11, %v837_v39, %v1805_v8  ;;  %v890_v24 = vcombine.low %v2309_v10, %v2313_v15  ;;  %vm2512_vm11 = vcmp.gt.f32.partialorder %v2260_v30, 0.0 }
 0x5b5   :  { %v1899_v20 = vpop.eup %1898  ;;  %v1808_v22 = vadd.f32 -1.0, %v1897_v16  ;;  %v2317_v23 = vsel %vm846_vm12, %v838_v40, %v1806_v14  ;;  %v898_v25 = vcombine.low %v2311_v11, %v2315_v19  ;;  %vm2513_vm12 = vmmov %vm2512_vm11 }
 0x5b6   :  { %v1809_v26 = vadd.f32 -1.0, %v1899_v20  ;;  %v2323_v28 = vsel %vm847_vm10, %v839_v42, %v1807_v18  ;;  %v897_v34 = vrot.slane %v890_v24, %v2160_v12  ;;  %vm950_vm10 = vcmask 130048  }
 0x5b7   :  { %v2325_v31 = vsel %vm848_vm13, %v840_v41, %v1808_v22  ;;  %v905_v32 = vrot.slane %v898_v25, %v2160_v12  ;;  %vm2514_vm13 = vmmov %vm2512_vm11 }
 0x5b8   :  { %v2328_v29 = vsel %vm849_vm14, %v841_v43, %v1809_v26  ;;  %v906_v33 = vcombine.low %v2317_v23, %v2325_v31  ;;  %vm2515_vm14 = vmmov %vm2512_vm11 }
 0x5b9   :  { %v914_v35 = vcombine.low %v2323_v28, %v2328_v29  ;;  %v922_v37 = vcombine.low %v897_v34, %v905_v32 }
 0x5ba   :  { %v913_v7 = vrot.slane %v906_v33, %v2160_v12 }
 0x5bb   :  { %v921_v36 = vrot.slane %v914_v35, %v2160_v12  ;;  %v929_v39 = vrot.slane %v922_v37, %v2165_v17 }
 0x5bd   :  { %v930_v38 = vcombine.low %v913_v7, %v921_v36 }
 0x5bf   :  { %v937_v40 = vrot.slane %v930_v38, %v2165_v17 }
 0x5c1   :  { %v939_v41 = vcombine.high %v929_v39, %v937_v40  ;;  %v938_v42 = vcombine.low %v929_v39, %v937_v40 }
 0x5c3   :  { %941 = vrot.lane.b32.xlu1 %v939_v41, %s2037_s6 }
 0x635   :  { %v942_v43 = vpop.permute.xlu1 %941 }
 0x636   :  { %v944_v44 = vsel %vm90_vm1, %v938_v42, %v942_v43 }
 0x637   :  { %1848 = vmatmul.mubr.msk.f32.vlgmr.msra.gmra.mrb[2].mxu1 %vm950_vm10, %v944_v44  ;;  %v947_v44 = vld [vmem:[%s2507_s7] sm:$0x3] }
 0x638   :  { %1857 = vmatprep.mubr.msk.f32.mxu1 %vm2031_vm0, %v2030_v0 }
 0x70a   :  { %v1020_v45 = vpop.f32.mrb[2].mxu1 }
 0x70b   :  { %1025 = vrot.lane.b32.xlu1 %v1020_v45, %s2032_s19  ;;  %v1849_v46 = vpop.f32.mrb[3].mxu1  ;;  %v1028_v47 = vcombine.high %v1020_v45, %v2030_v0  ;;  %v1035_v49 = vrot.slane %v1020_v45, %v2160_v12 }
 0x70d   :  { %v1042_v54 = vrot.slane %v1028_v47, %v2160_v12 }
 0x77d   :  { %v1026_v48 = vpop.permute.xlu1 %1025 }
 0x77e   :  { %v1043_v51 = vcombine.high %v1026_v48, %v2030_v0  ;;  %v1050_v52 = vrot.slane %v1026_v48, %v2160_v12 }
 0x780   :  { %v1057_v55 = vrot.slane %v1043_v51, %v2160_v12  ;;  %v1058_v56 = vcombine.low %v1035_v49, %v1050_v52  ;;  %v1059_v57 = vcombine.high %v1035_v49, %v1050_v52 }
 0x782   :  { %v1066_v59 = vrot.slane %v1058_v56, %v2165_v17  ;;  %v1073_v60 = vrot.slane %v1059_v57, %v2165_v17  ;;  %v1074_v61 = vcombine.low %v1042_v54, %v1057_v55  ;;  %v1075_v62 = vcombine.high %v1042_v54, %v1057_v55 }
 0x784   :  { %v1082_v63 = vrot.slane %v1074_v61, %v2165_v17  ;;  %v2356_v1 = vrot.slane %v1075_v62, %v2165_v17  ;;  %v1126_v2 = vmul.f32 %v1066_v59, %v948_v58  ;;  %v1090_v3 = vcombine.high %v1066_v59, %v2030_v0 }
 0x785   :  { %v1128_v4 = vmul.f32 %v1073_v60, %v948_v58  ;;  %v1091_v5 = vcombine.high %v1073_v60, %v2030_v0  ;;  %v1401_v6 = vcombine.low %v1066_v59, %v1073_v60  ;;  %v1811_v8 = vcombine.high %v1066_v59, %v1073_v60 }
 0x786   :  { %v1134_v13 = vsel %vm242_vm2, %v1126_v2, 0.0  ;;  %v1127_v14 = vmul.f32 %v1090_v3, %v948_v58  ;;  %v1092_v16 = vcombine.high %v1082_v63, %v2030_v0  ;;  %v1417_v18 = vcombine.low %v1082_v63, %v2356_v1 }
 0x787   :  { %1135 = vadd.xlane.f32.xlu0 %v1134_v13  ;;  %v1408_v20 = vrot.slane %v1401_v6, %v2160_v12  ;;  %v1416_v22 = vrot.slane %v1811_v8, %v2160_v12  ;;  %v1812_v32 = vcombine.high %v1082_v63, %v2356_v1  ;;  %v1093_v33 = vcombine.high %v2356_v1, %v2030_v0 }
 0x788   :  { %v1137_v24 = vsel %vm242_vm2, %v1127_v14, 0.0  ;;  %v1131_v25 = vmul.f32 %v1092_v16, %v948_v58  ;;  %v1424_v26 = vrot.slane %v1417_v18, %v2160_v12  ;;  %v1140_v34 = vsel %vm242_vm2, %v1128_v4, 0.0 }
 0x789   :  { %1138 = vadd.xlane.f32.xlu1 %v1137_v24  ;;  %v1129_v35 = vmul.f32 %v1091_v5, %v948_v58  ;;  %v1432_v7 = vrot.slane %v1812_v32, %v2160_v12  ;;  %v1433_v36 = vcombine.low %v1408_v20, %v1416_v22  ;;  %v1133_v39 = vmul.f32 %v1093_v33, %v948_v58 }
 0x78a   :  { %v1149_v37 = vsel %vm242_vm2, %v1131_v25, 0.0  ;;  %v1130_v43 = vmul.f32 %v1082_v63, %v948_v58  ;;  %v1095_v48 = vmul.f32 %v1090_v3, %v947_v44  ;;  %v1132_v51 = vmul.f32 %v2356_v1, %v948_v58 }
 0x78b   :  { %1141 = vadd.xlane.f32.xlu0 %v1140_v34  ;;  %v1441_v38 = vcombine.low %v1424_v26, %v1432_v7  ;;  %v1143_v40 = vsel %vm242_vm2, %v1129_v35, 0.0  ;;  %v1440_v41 = vrot.slane %v1433_v36, %v2165_v17  ;;  %v1155_v47 = vsel %vm242_vm2, %v1133_v39, 0.0 }
 0x78c   :  { %v1146_v49 = vsel %vm242_vm2, %v1130_v43, 0.0  ;;  %v1105_v52 = vsel %vm242_vm2, %v1095_v48, 0.0  ;;  %v1097_v54 = vmul.f32 %v1091_v5, %v947_v44  ;;  %v1152_v55 = vsel %vm242_vm2, %v1132_v51, 0.0 }
 0x78d   :  { %1150 = vadd.xlane.f32.xlu1 %v1149_v37  ;;  %v1448_v42 = vrot.slane %v1441_v38, %v2165_v17  ;;  %v1094_v56 = vmul.f32 %v1066_v59, %v947_v44  ;;  %v1099_v61 = vmul.f32 %v1092_v16, %v947_v44  ;;  %v1096_v2 = vmul.f32 %v1073_v60, %v947_v44 }
 0x78e   :  { %v1111_v57 = vsel %vm242_vm2, %v1097_v54, 0.0  ;;  %v1101_v58 = vmul.f32 %v1093_v33, %v947_v44  ;;  %v1098_v5 = vmul.f32 %v1082_v63, %v947_v44  ;;  %v1100_v8 = vmul.f32 %v2356_v1, %v947_v44 }
 0x78f   :  { %1144 = vadd.xlane.f32.xlu0 %v1143_v40  ;;  %v1449_v45 = vcombine.low %v1440_v41, %v1448_v42  ;;  %v1450_v46 = vcombine.high %v1440_v41, %v1448_v42  ;;  %v1102_v62 = vsel %vm242_vm2, %v1094_v56, 0.0  ;;  %v1117_v3 = vsel %vm242_vm2, %v1099_v61, 0.0 }
 0x790   :  { %v1108_v4 = vsel %vm242_vm2, %v1096_v2, 0.0  ;;  %v1123_v6 = vsel %vm242_vm2, %v1101_v58, 0.0  ;;  %v1114_v59 = vsel %vm242_vm2, %v1098_v5, 0.0  ;;  %v1120_v13 = vsel %vm242_vm2, %v1100_v8, 0.0 }
 0x791   :  { %1156 = vadd.xlane.f32.xlu1 %v1155_v47  ;;  %1851 = vmatpush3.msra.mxu0 %v1449_v45 }
 0x792   :  { %1856 = vmatpush3.msra.mxu1 %v1450_v46 }
 0x793   :  { %1147 = vadd.xlane.f32.xlu0 %v1146_v49 }
 0x795   :  { %1106 = vadd.xlane.f32.xlu1 %v1105_v52 }
 0x797   :  { %1153 = vadd.xlane.f32.xlu0 %v1152_v55 }
 0x799   :  { %1112 = vadd.xlane.f32.xlu1 %v1111_v57 }
 0x79b   :  { %1103 = vadd.xlane.f32.xlu0 %v1102_v62 }
 0x79d   :  { %1118 = vadd.xlane.f32.xlu1 %v1117_v3 }
 0x79f   :  { %1109 = vadd.xlane.f32.xlu0 %v1108_v4 }
 0x7a1   :  { %1124 = vadd.xlane.f32.xlu1 %v1123_v6 }
 0x7a3   :  { %1115 = vadd.xlane.f32.xlu0 %v1114_v59 }
 0x7a7   :  { %1121 = vadd.xlane.f32.xlu0 %v1120_v13 }
 0x814   :  { %v1136_v60 = vpop.xlane.xlu0 %1135 }
 0x815   :  { %v1169_v20 = vrot.slane %v1136_v60, %v2214_v27 }
 0x816   :  { %v1139_v14 = vpop.xlane.xlu1 %1138 }
 0x817   :  { %v1173_v18 = vrot.slane %v1139_v14, %v2214_v27 }
 0x818   :  { %v1142_v16 = vpop.xlane.xlu0 %1141 }
 0x819   :  { %v1177_v22 = vrot.slane %v1142_v16, %v2214_v27  ;;  %v1198_v25 = vsel %vm341_vm3, %v1173_v18, %v1169_v20 }
 0x81a   :  { %v1151_v24 = vpop.xlane.xlu1 %1150 }
 0x81b   :  { %v1199_v32 = vsel %vm343_vm4, %v1177_v22, %v1198_v25  ;;  %v1189_v36 = vrot.slane %v1151_v24, %v2214_v27 }
 0x81c   :  { %v1145_v63 = vpop.xlane.xlu0 %1144 }
 0x81d   :  { %v1181_v26 = vrot.slane %v1145_v63, %v2214_v27 }
 0x81e   :  { %v1157_v35 = vpop.xlane.xlu1 %1156 }
 0x81f   :  { %v1200_v34 = vsel %vm345_vm5, %v1181_v26, %v1199_v32  ;;  %v1197_v39 = vrot.slane %v1157_v35, %v2214_v27 }
 0x820   :  { %v1148_v1 = vpop.xlane.xlu0 %1147 }
 0x821   :  { %v1185_v33 = vrot.slane %v1148_v1, %v2214_v27 }
 0x822   :  { %v1107_v51 = vpop.xlane.xlu1 %1106 }
 0x823   :  { %v1201_v7 = vsel %vm347_vm6, %v1185_v33, %v1200_v34  ;;  %v1267_v56 = vrot.slane %v1107_v51, %v2214_v27 }
 0x824   :  { %v1154_v37 = vpop.xlane.xlu0 %1153  ;;  %v1202_v40 = vsel %vm349_vm7, %v1189_v36, %v1201_v7 }
 0x825   :  { %v1193_v38 = vrot.slane %v1154_v37, %v2214_v27 }
 0x826   :  { %v1113_v52 = vpop.xlane.xlu1 %1112 }
 0x827   :  { %v1203_v41 = vsel %vm351_vm8, %v1193_v38, %v1202_v40  ;;  %v1275_v3 = vrot.slane %v1113_v52, %v2214_v27 }
 0x828   :  { %v1204_v42 = vsel %vm353_vm9, %v1197_v39, %v1203_v41  ;;  %v1104_v43 = vpop.xlane.xlu0 %1103 }
 0x829   :  { %1206 = vxpose.xlu0.b32.start.end [1/1] (short) (narrow) %v1204_v42, 8  ;;  %v1263_v54 = vrot.slane %v1104_v43, %v2214_v27 }
 0x82a   :  { %v1119_v61 = vpop.xlane.xlu1 %1118 }
 0x82b   :  { %v1292_v57 = vsel %vm341_vm3, %v1267_v56, %v1263_v54  ;;  %v1283_v4 = vrot.slane %v1119_v61, %v2214_v27 }
 0x82c   :  { %v1110_v44 = vpop.xlane.xlu0 %1109 }
 0x82d   :  { %v1271_v55 = vrot.slane %v1110_v44, %v2214_v27 }
 0x82e   :  { %v1125_v5 = vpop.xlane.xlu1 %1124 }
 0x82f   :  { %v1293_v62 = vsel %vm343_vm4, %v1271_v55, %v1292_v57  ;;  %v1291_v8 = vrot.slane %v1125_v5, %v2214_v27 }
 0x830   :  { %v1116_v45 = vpop.xlane.xlu0 %1115  ;;  %v1294_v9 = vsel %vm345_vm5, %v1275_v3, %v1293_v62 }
 0x831   :  { %v1279_v2 = vrot.slane %v1116_v45, %v2214_v27 }
 0x834   :  { %v1122_v46 = vpop.xlane.xlu0 %1121 }
 0x835   :  { %v1287_v58 = vrot.slane %v1122_v46, %v2214_v27 }
 0x8a9   :  { %v1222_v47 = vpop.trf.xlu0 }
 0x8aa   :  { %v1241_v48 = vrot.slane %v1222_v47, %v2232_v50  ;;  %v1248_v49 = vrot.slane %v1222_v47, %v397_v53  ;;  %v1295_v53 = vsel %vm347_vm6, %v1279_v2, %v1294_v9 }
 0x8ab   :  { %v1296_v6 = vsel %vm349_vm7, %v1283_v4, %v1295_v53 }
 0x8ac   :  { %1243 = vbcast.lane.b32.xlu1 %v1241_v48, 256  ;;  %v1297_v59 = vsel %vm351_vm8, %v1287_v58, %v1296_v6 }
 0x8ad   :  { %v1298_v13 = vsel %vm353_vm9, %v1291_v8, %v1297_v59 }
 0x8b0   :  { %1250 = vbcast.lane.b32.xlu1 %v1248_v49, 256  ;;  %v949_v49 = vld [vmem:[%s2509_s9] sm:$0x1]  ;;  %s2038_s9 = smov [#allocation10]  }
 0x8b1   :  { %s1786_s0 = sshll.u32 %s2038_s9, 4  ;;  %s1787_s0 = int_to_ptr.vmem [resolvable:$true] %s1786_s0 }
 0x8b2   :  { %s1996_s16 = scalar_lea.vmem %s1787_s0, 128  ;;  %p2001_p5 = scmp.lt.s32.totalorder %s1787_s0, %s1787_s0 }
 0x8b3   :  { %p1997_p4 = scmp.ne.s32.totalorder %s1787_s0, %s1996_s16  ;;  %p2002_p6 = scmp.lt.s32.totalorder %s1996_s16, %s1996_s16 }
 0x8b5   :  { %p2003_p7 = por %p2002_p6, %p2001_p5 }
 0x8b7   :  { %p2004_p8 = pnand %p2003_p7, %p1997_p4 }
 0x8d9   :  { %1300 = vxpose.xlu1.b32.start.end [1/1] (short) (narrow) %v1298_v13, 8 }
 0x91e   :  { %v1244_v60 = vpop.permute.xlu1 %1243 }
 0x922   :  { %v1251_v14 = vpop.permute.xlu1 %1250 }
 0x959   :  { %v1316_v16 = vpop.trf.xlu1 }
 0x95a   :  { %v1339_v18 = vrot.slane %v1316_v16, %v2254_v21 }
 0x95c   :  { %v1340_v20 = vcombine.high %v1339_v18, %v1339_v18  ;;  %v1347_v63 = vrot.slane %v1339_v18, %v2254_v21 }
 0x95e   :  { %v1354_v22 = vrot.slane %v1340_v20, %v2254_v21  ;;  %v1358_v24 = vrot.slane %v1347_v63, %v2232_v50 }
 0x960   :  { %v1362_v25 = vrot.slane %v1354_v22, %v2232_v50  ;;  %v1365_v26 = vadd.f32 %v1358_v24, %v1244_v60 }
 0x962   :  { %vm1367_vm0 = vcmp.gt.f32.partialorder %v1365_v26, 0.0  ;;  %v1369_v27 = vmul.f32 0.2, %v1365_v26  ;;  %v1366_v1 = vadd.f32 %v1362_v25, %v1251_v14 }
 0x964   :  { %v1371_v32 = vsel %vm1367_vm0, %v1365_v26, %v1369_v27  ;;  %vm1368_vm15 = vcmp.gt.f32.partialorder %v1366_v1, 0.0  ;;  %v1370_v33 = vmul.f32 0.2, %v1366_v1 }
 0x965   :  { %v1373_v34 = vsel %vm2512_vm11, %v1371_v32, -1e+30 }
 0x966   :  { %v1375_v35 = vsel %vm90_vm1, %v1373_v34, -inf  ;;  %v1372_v7 = vsel %vm1368_vm15, %v1366_v1, %v1370_v33 }
 0x967   :  { %1376 = vmax.xlane.f32.xlu0 %v1375_v35  ;;  %v1374_v36 = vsel %vm2513_vm12, %v1372_v7, -1e+30 }
 0x968   :  { %v1378_v37 = vsel %vm90_vm1, %v1374_v36, -inf }
 0x969   :  { %1379 = vmax.xlane.f32.xlu1 %v1378_v37 }
 0x9f4   :  { %v1377_v50 = vpop.xlane.xlu0 %1376 }
 0x9f5   :  { %v1381_v38 = vsub.f32 %v1373_v34, %v1377_v50 }
 0x9f6   :  { %v1380_v39 = vpop.xlane.xlu1 %1379 }
 0x9f7   :  { %v1383_v40 = vmul.f32 1.442695, %v1381_v38  ;;  %v1382_v41 = vsub.f32 %v1374_v36, %v1380_v39 }
 0x9f9   :  { %1900 = vpow2.f32 %v1383_v40  ;;  %v1385_v42 = vmul.f32 1.442695, %v1382_v41 }
 0x9fb   :  { %1902 = vpow2.f32 %v1385_v42 }
 0xa03   :  { %v1901_v43 = vpop.eup %1900 }
 0xa04   :  { %v1387_v44 = vsel %vm2514_vm13, %v1901_v43, 0.0 }
 0xa05   :  { %v1903_v45 = vpop.eup %1902  ;;  %v1389_v46 = vsel %vm90_vm1, %v1387_v44, 0.0 }
 0xa06   :  { %1390 = vadd.xlane.f32.xlu0 %v1389_v46  ;;  %v1388_v47 = vsel %vm2515_vm14, %v1903_v45, 0.0 }
 0xa07   :  { %v1392_v48 = vsel %vm90_vm1, %v1388_v47, 0.0 }
 0xa0a   :  { %1393 = vadd.xlane.f32.xlu0 %v1392_v48 }
 0xa20   :  { %1672 = vrot.lane.b32.xlu0 %v949_v49, %s2032_s19 }
 0xa93   :  { %v1391_v51 = vpop.xlane.xlu0 %1390 }
 0xa94   :  { %v1395_v52 = vmax.f32 %v1391_v51, 1e-09 }
 0xa96   :  { %1904 = vrcp.f32 %v1395_v52 }
 0xa97   :  { %v1394_v54 = vpop.xlane.xlu0 %1393 }
 0xa98   :  { %v1396_v55 = vmax.f32 %v1394_v54, 1e-09 }
 0xa9a   :  { %1906 = vrcp.f32 %v1396_v55 }
 0xa9b   :  { %v1673_v62 = vpop.permute.xlu0 %1672 }
 0xa9c   :  { %v1674_v9 = vcombine.low %v949_v49, %v1673_v62 }
 0xa9e   :  { %v1681_v8 = vrot.slane %v1674_v9, %v2254_v21 }
 0xaa0   :  { %v1905_v56 = vpop.eup %1904  ;;  %v1688_v24 = vrot.slane %v1681_v8, %v2254_v21 }
 0xaa1   :  { %v1398_v57 = vmul.f32 %v1905_v56, %v1387_v44 }
 0xaa3   :  { %1853 = vmatmul.mubr.msk.f32.vlgmr.msra.gmra.mrb[4].mxu0 %vm90_vm1, %v1398_v57 }
 0xaa4   :  { %v1907_v30 = vpop.eup %1906 }
 0xaa5   :  { %v1400_v61 = vmul.f32 %v1907_v30, %v1388_v47 }
 0xaa7   :  { %1858 = vmatmul.mubr.msk.f32.vlgmr.msra.gmra.mrb[4].mxu1 %vm90_vm1, %v1400_v61 }
 0xb76   :  { %v1520_v2 = vpop.f32.mrb[4].mxu0 }
 0xb77   :  { %v1854_v3 = vpop.f32.mrb[5].mxu0  ;;  %v1597_v53 = vcombine.high %v1520_v2, %v2030_v0  ;;  %v1604_v4 = vrot.slane %v1520_v2, %v2160_v12 }
 0xb79   :  { %v1611_v13 = vrot.slane %v1597_v53, %v2160_v12 }
 0xb7a   :  { %v1593_v58 = vpop.f32.mrb[4].mxu1 }
 0xb7b   :  { %v1612_v5 = vcombine.high %v1593_v58, %v2030_v0  ;;  %v1619_v6 = vrot.slane %v1593_v58, %v2160_v12  ;;  %v1859_v59 = vpop.f32.mrb[5].mxu1 }
 0xb7d   :  { %v1626_v60 = vrot.slane %v1612_v5, %v2160_v12  ;;  %v1627_v14 = vcombine.low %v1604_v4, %v1619_v6  ;;  %v1628_v16 = vcombine.high %v1604_v4, %v1619_v6 }
 0xb7f   :  { %v1635_v18 = vrot.slane %v1627_v14, %v2165_v17  ;;  %v1642_v20 = vrot.slane %v1628_v16, %v2165_v17  ;;  %v1643_v63 = vcombine.low %v1611_v13, %v1626_v60  ;;  %v1644_v22 = vcombine.high %v1611_v13, %v1626_v60 }
 0xb81   :  { %v1651_v25 = vrot.slane %v1643_v63, %v2165_v17  ;;  %v1658_v26 = vrot.slane %v1644_v22, %v2165_v17  ;;  %v1659_v27 = vcombine.high %v1635_v18, %v2030_v0  ;;  %v1660_v1 = vcombine.high %v1642_v20, %v2030_v0 }
 0xb82   :  { %v1663_v12 = vadd.f32 %v1635_v18, %v2309_v10  ;;  %v1665_v32 = vadd.f32 %v1642_v20, %v2313_v15 }
 0xb83   :  { %v1661_v33 = vcombine.high %v1651_v25, %v2030_v0  ;;  %v1662_v34 = vcombine.high %v1658_v26, %v2030_v0  ;;  %v1664_v35 = vadd.f32 %v1659_v27, %v2311_v11  ;;  %v1666_v21 = vadd.f32 %v1660_v1, %v2315_v19 }
 0xb84   :  { %v1667_v7 = vadd.f32 %v1651_v25, %v2317_v23  ;;  %v1669_v17 = vadd.f32 %v1658_v26, %v2325_v31  ;;  %v1690_v36 = vadd.f32 %v1688_v24, %v1663_v12  ;;  %v1692_v37 = vadd.f32 %v1688_v24, %v1665_v32 }
 0xb85   :  { %v1668_v50 = vadd.f32 %v1661_v33, %v2323_v28  ;;  %v1670_v10 = vadd.f32 %v1662_v34, %v2328_v29  ;;  %v1691_v38 = vadd.f32 %v1688_v24, %v1664_v35  ;;  %v1693_v15 = vadd.f32 %v1688_v24, %v1666_v21 }
 0xb86   :  { %v1694_v39 = vadd.f32 %v1688_v24, %v1667_v7  ;;  %v1696_v40 = vadd.f32 %v1688_v24, %v1669_v17  ;;  %v1698_v0 = vsel %vm242_vm2, %v1690_v36, 0.0  ;;  %v1712_v11 = vsel %vm242_vm2, %v1692_v37, 0.0 }
 0xb87   :  { %v1695_v41 = vadd.f32 %v1688_v24, %v1668_v50  ;;  %v1697_v19 = vadd.f32 %v1688_v24, %v1670_v10  ;;  %v1699_v42 = vrot.slane %v1698_v0, 4  ;;  %v1705_v23 = vsel %vm242_vm2, %v1691_v38, 0.0 }
 0xb88   :  { %v1706_v31 = vrot.slane %v1705_v23, 4  ;;  %v1713_v43 = vrot.slane %v1712_v11, 4  ;;  %v1719_v44 = vsel %vm242_vm2, %v1693_v15, 0.0  ;;  %v1726_v28 = vsel %vm242_vm2, %v1694_v39, 0.0 }
 0xb89   :  { %v1700_v29 = vadd.f32 %v1699_v42, %v1698_v0  ;;  %v1720_v45 = vrot.slane %v1719_v44, 4  ;;  %v1727_v46 = vrot.slane %v1726_v28, 4  ;;  %v1733_v47 = vsel %vm242_vm2, %v1695_v41, 0.0 }
 0xb8a   :  { %v1707_v48 = vadd.f32 %v1706_v31, %v1705_v23  ;;  %v1714_v49 = vadd.f32 %v1713_v43, %v1712_v11  ;;  %v1734_v51 = vrot.slane %v1733_v47, 4  ;;  %v1740_v52 = vsel %vm242_vm2, %v1696_v40, 0.0 }
 0xb8b   :  { %v1701_v54 = vrot.slane %v1700_v29, 2  ;;  %v1721_v55 = vadd.f32 %v1720_v45, %v1719_v44  ;;  %v1728_v56 = vadd.f32 %v1727_v46, %v1726_v28  ;;  %v1741_v57 = vrot.slane %v1740_v52, 4 }
 0xb8c   :  { %v1708_v30 = vrot.slane %v1707_v48, 2  ;;  %v1715_v61 = vrot.slane %v1714_v49, 2  ;;  %v1735_v62 = vadd.f32 %v1734_v51, %v1733_v47  ;;  %v1747_v2 = vsel %vm242_vm2, %v1697_v19, 0.0 }
 0xb8d   :  { %v1702_v3 = vadd.f32 %v1701_v54, %v1700_v29  ;;  %v1722_v9 = vrot.slane %v1721_v55, 2  ;;  %v1729_v53 = vrot.slane %v1728_v56, 2  ;;  %v1742_v58 = vadd.f32 %v1741_v57, %v1740_v52 }
 0xb8e   :  { %v1709_v4 = vadd.f32 %v1708_v30, %v1707_v48  ;;  %v1716_v5 = vadd.f32 %v1715_v61, %v1714_v49  ;;  %v1736_v6 = vrot.slane %v1735_v62, 2  ;;  %v1748_v59 = vrot.slane %v1747_v2, 4 }
 0xb8f   :  { %v1703_v8 = vrot.slane %v1702_v3, 1  ;;  %v1723_v13 = vadd.f32 %v1722_v9, %v1721_v55  ;;  %v1730_v60 = vadd.f32 %v1729_v53, %v1728_v56  ;;  %v1743_v14 = vrot.slane %v1742_v58, 2 }
 0xb90   :  { %v1710_v16 = vrot.slane %v1709_v4, 1  ;;  %v1717_v18 = vrot.slane %v1716_v5, 1  ;;  %v1737_v20 = vadd.f32 %v1736_v6, %v1735_v62  ;;  %v1749_v63 = vadd.f32 %v1748_v59, %v1747_v2 }
 0xb91   :  { %v1704_v22 = vadd.f32 %v1703_v8, %v1702_v3  ;;  %v1724_v24 = vrot.slane %v1723_v13, 1  ;;  %v1731_v25 = vrot.slane %v1730_v60, 1  ;;  %v1744_v26 = vadd.f32 %v1743_v14, %v1742_v58 }
 0xb92   :  { %v1711_v27 = vadd.f32 %v1710_v16, %v1709_v4  ;;  %v1718_v1 = vadd.f32 %v1717_v18, %v1716_v5  ;;  %v1738_v12 = vrot.slane %v1737_v20, 1  ;;  %v1750_v32 = vrot.slane %v1749_v63, 2 }
 0xb93   :  { %v1725_v33 = vadd.f32 %v1724_v24, %v1723_v13  ;;  %v1732_v34 = vadd.f32 %v1731_v25, %v1730_v60  ;;  %v1745_v35 = vrot.slane %v1744_v26, 1  ;;  %v1755_v17 = vmul.f32 0.5, %v1704_v22 }
 0xb94   :  { %v1739_v21 = vadd.f32 %v1738_v12, %v1737_v20  ;;  %v1751_v7 = vadd.f32 %v1750_v32, %v1749_v63  ;;  %v1756_v36 = vmul.f32 0.5, %v1711_v27  ;;  %v1757_v50 = vmul.f32 0.5, %v1718_v1 }
 0xb95   :  { %v1746_v37 = vadd.f32 %v1745_v35, %v1744_v26  ;;  %v1758_v38 = vmul.f32 0.5, %v1725_v33  ;;  %v1759_v39 = vmul.f32 0.5, %v1732_v34 }
 0xb96   :  { %v1752_v10 = vrot.slane %v1751_v7, 1  ;;  %v1771_v15 = vsel %vm341_vm3, %v1756_v36, %v1755_v17  ;;  %v1760_v11 = vmul.f32 0.5, %v1739_v21 }
 0xb97   :  { %v1772_v40 = vsel %vm343_vm4, %v1757_v50, %v1771_v15  ;;  %v1761_v19 = vmul.f32 0.5, %v1746_v37 }
 0xb98   :  { %v1753_v0 = vadd.f32 %v1752_v10, %v1751_v7  ;;  %v1773_v41 = vsel %vm345_vm5, %v1758_v38, %v1772_v40 }
 0xb99   :  { %v1774_v42 = vsel %vm347_vm6, %v1759_v39, %v1773_v41 }
 0xb9a   :  { %v1762_v23 = vmul.f32 0.5, %v1753_v0  ;;  %v1775_v31 = vsel %vm349_vm7, %v1760_v11, %v1774_v42 }
 0xb9b   :  { %v1776_v43 = vsel %vm351_vm8, %v1761_v19, %v1775_v31 }
 0xb9c   :  { %v1777_v44 = vsel %vm353_vm9, %v1762_v23, %v1776_v43 }
 0xb9d   :  { %1779 = vst.msk [vmem:[#allocation10] sm:$0xff] %vm90_vm1, %v1777_v44 }
 0xb9e   :  { %2007 = shalt.err (!%p2004_p8)
}
 0xb9f   :  { %s2008_s30 = scalar_lea.hbm %s2510_s10, 128 }
 0xba0   :  { %p2009_p9 = scmp.ne.s32.totalorder %s2510_s10, %s2008_s30  ;;  %p2012_p10 = scmp.lt.u32.totalorder %s2008_s30, %s2510_s10 }
 0xba2   :  { %p2014_p11 = pnand %p2012_p10, %p2009_p9 }
 0xba4   :  { %2017 = shalt.err (!%p2014_p11)
}
 0xba5   :  { %1789 = dma.vmem_to_hbm [thread:$0]  %s1787_s0, 128, %s2510_s10, [#allocation4]  }
 0xba6   :  { %2024 = dma.done.wait [#allocation4], 128  }
 0xba7   :  { %2025 = vsyncadd [#allocation4], 4294967168 }
 0xba8   :  { %1793 = vsyncpa [#allocation3], 1 }
 0xba9   :  { %1794 = vsyncpa [#allocation6], 1 }
 0xbaa   :  { %1795 = vsyncpa [#allocation9], 1 }
 0xbab   :  { %1796 = vsyncpa [#allocation4], 1 }

</bundles_post_ra>
